<compile_context>
chip_gen: v7x
topology: tpu7x:2x2x1
jax: 0.10.0
libtpu: 0.0.40
codegen_flags: <defaults>
</compile_context>

<pallas_src>
import math

import jax
import jax.numpy as jnp
from jax.experimental import pallas as pl
from jax.experimental.pallas import tpu as pltpu

_LANE = 128
_MIB = 1024 * 1024


def _round_up(x, m):
    return (x + m - 1) // m * m


def _largest_divisor(m, cap, min_tiles=1):
    """Largest g <= cap dividing m with m // g >= min_tiles (falls back to 1)."""
    best = 1
    for g in range(1, min(cap, m) + 1):
        if m % g == 0 and m // g >= min_tiles:
            best = g
    return best


# ----------------------------------------------------------------------------
# Kernels
# ----------------------------------------------------------------------------
def _gate_transform_kernel(gamma_ref, miu_ref, sigma_ref, wmiu_ref, wsigma_ref,
                           xmu_ref, xsg_ref):
    """Per-row-tile: attention gating (f32 VPU/EUP) + feature transform (MXU)."""
    gamma = gamma_ref[0]
    miu = miu_ref[...].astype(jnp.float32)
    sigma = sigma_ref[...].astype(jnp.float32)

    att = jnp.exp(-gamma * sigma)                  # EUP transcendental, f32
    gated_miu = miu * att                          # VPU, f32
    gated_sigma = sigma * att * att

    cd = wmiu_ref.dtype                            # compute dtype (bf16 or f32)
    xmu_ref[...] = jnp.dot(gated_miu.astype(cd), wmiu_ref[...],
                           preferred_element_type=jnp.float32).astype(xmu_ref.dtype)
    xsg_ref[...] = jnp.dot(gated_sigma.astype(cd), wsigma_ref[...],
                           preferred_element_type=jnp.float32).astype(xsg_ref.dtype)


def _make_adj_agg_kernel(tk, resident_x):
    """Tiled adj aggregation: M = adj1 @ X_mu, Sigma = adj2 @ X_sg.

    adj tiles arrive in their native (f32) dtype and are cast to the MXU
    compute dtype in-register.  Accumulation is done directly into the f32
    output blocks (resident across the reduction axis)."""
    def kernel(adj1_ref, adj2_ref, xmu_ref, xsg_ref, m_ref, s_ref):
        k = pl.program_id(1)

        @pl.when(k == 0)
        def _():
            m_ref[...] = jnp.zeros_like(m_ref)
            s_ref[...] = jnp.zeros_like(s_ref)

        if resident_x:
            # X_mu / X_sg are fully VMEM-resident: slice the k-th chunk.
            off = pl.multiple_of(k * tk, _LANE)
            xmu = xmu_ref[pl.ds(off, tk), :]
            xsg = xsg_ref[pl.ds(off, tk), :]
        else:
            xmu = xmu_ref[...]
            xsg = xsg_ref[...]

        cd = xmu.dtype
        m_ref[...] += jnp.dot(adj1_ref[...].astype(cd), xmu,
                              preferred_element_type=jnp.float32)
        s_ref[...] += jnp.dot(adj2_ref[...].astype(cd), xsg,
                              preferred_element_type=jnp.float32)

    return kernel


def _plain_mm_kernel(x_ref, w_ref, o_ref):
    """adj-free branch: previous_miu @ weight_miu (row-tiled)."""
    o_ref[...] = jnp.dot(x_ref[...], w_ref[...],
                         preferred_element_type=jnp.float32).astype(o_ref.dtype)


# ----------------------------------------------------------------------------
# Wrapper
# ----------------------------------------------------------------------------
def gaussian_convolution(previous_miu, previous_sigma, weight_miu, weight_sigma,
                         adj_norm1=None, adj_norm2=None, gamma=1.0,
                         compute_dtype=jnp.bfloat16):
    n, fin = previous_miu.shape
    fout = weight_miu.shape[1]
    out_dtype = previous_miu.dtype
    fout_pad = _round_up(fout, _LANE)              # lane-dense output width
    cd_bytes = jnp.dtype(compute_dtype).itemsize

    # Zero-pad weights to a lane-dense width; cast once for MXU (f32 accum).
    w_mu = jnp.pad(weight_miu, ((0, 0), (0, fout_pad - fout))).astype(compute_dtype)
    w_sg = jnp.pad(weight_sigma, ((0, 0), (0, fout_pad - fout))).astype(compute_dtype)

    # ----- adj-free branch -------------------------------------------------
    if adj_norm1 is None and adj_norm2 is None:
        n_pad = _round_up(n, 8)
        tm = n_pad if n_pad <= 512 else 256
        n_pad = _round_up(n_pad, tm)
        x = jnp.pad(previous_miu, ((0, n_pad - n), (0, 0))).astype(compute_dtype)
        out = pl.pallas_call(
            _plain_mm_kernel,
            grid=(n_pad // tm,),
            out_shape=jax.ShapeDtypeStruct((n_pad, fout_pad), out_dtype),
            in_specs=[pl.BlockSpec((tm, fin), lambda i: (i, 0)),
                      pl.BlockSpec((fin, fout_pad), lambda i: (0, 0))],
            out_specs=pl.BlockSpec((tm, fout_pad), lambda i: (i, 0)),
            compiler_params=pltpu.CompilerParams(
                dimension_semantics=("parallel",)),
        )(x, w_mu)
        mm = out[:n, :fout]
        return mm, mm

    # ----- main branch ------------------------------------------------------
    # Pad only to 128 granularity (no tk-granularity quadratic blow-up); skip
    # the padding pass entirely when N is already a multiple of 128.  adj is
    # NOT pre-cast: it is DMA'd as f32 and cast inside the kernel.
    n_pad = _round_up(n, _LANE)
    if n_pad != n:
        miu_p = jnp.pad(previous_miu, ((0, n_pad - n), (0, 0)))
        sig_p = jnp.pad(previous_sigma, ((0, n_pad - n), (0, 0)))
        adj1_p = jnp.pad(adj_norm1, ((0, n_pad - n), (0, n_pad - n)))
        adj2_p = jnp.pad(adj_norm2, ((0, n_pad - n), (0, n_pad - n)))
    else:
        miu_p, sig_p, adj1_p, adj2_p = (previous_miu, previous_sigma,
                                        adj_norm1, adj_norm2)

    gamma_arr = jnp.asarray([gamma], dtype=jnp.float32)
    m_blocks = n_pad // _LANE

    # ---- Phase 1: gating + feature transform, once per row tile. -----------
    # Large row tile (weights stay VMEM-resident: constant block index); tile
    # capped so the phase-1 footprint stays well inside scoped VMEM.
    per_row_bytes = 2 * 2 * fin * 4 + 2 * 2 * fout_pad * cd_bytes
    cap_blocks = max(1, min(16, (16 * _MIB // per_row_bytes) // _LANE))
    tm1 = _LANE * _largest_divisor(m_blocks, cap_blocks)

    x_mu, x_sg = pl.pallas_call(
        _gate_transform_kernel,
        grid=(n_pad // tm1,),
        out_shape=(jax.ShapeDtypeStruct((n_pad, fout_pad), compute_dtype),
                   jax.ShapeDtypeStruct((n_pad, fout_pad), compute_dtype)),
        in_specs=[
            pl.BlockSpec(memory_space=pltpu.MemorySpace.SMEM),  # gamma scalar
            pl.BlockSpec((tm1, fin), lambda i: (i, 0)),         # previous_miu
            pl.BlockSpec((tm1, fin), lambda i: (i, 0)),         # previous_sigma
            pl.BlockSpec((fin, fout_pad), lambda i: (0, 0)),    # weight_miu
            pl.BlockSpec((fin, fout_pad), lambda i: (0, 0)),    # weight_sigma
        ],
        out_specs=(pl.BlockSpec((tm1, fout_pad), lambda i: (i, 0)),
                   pl.BlockSpec((tm1, fout_pad), lambda i: (i, 0))),
        compiler_params=pltpu.CompilerParams(
            dimension_semantics=("parallel",)),
    )(gamma_arr, miu_p, sig_p, w_mu, w_sg)

    # ---- Phase 2: tiled adjacency aggregation (HBM-bound, dominant cost). ---
    # Tiles divide n_pad exactly; keep >= 2 row tiles when possible so the
    # "parallel" axis shards across v7x's two TensorCores.
    tm = _LANE * _largest_divisor(m_blocks, 4,
                                  min_tiles=2 if m_blocks >= 2 else 1)
    tk = _LANE * _largest_divisor(m_blocks, 8)

    adj_bytes = jnp.dtype(adj1_p.dtype).itemsize
    adj_vmem = 2 * 2 * tm * tk * adj_bytes            # 2 matrices, double-buffer
    out_vmem = 2 * 2 * tm * fout_pad * 4               # 2 f32 outputs, double-buffer
    x_res_vmem = 2 * 2 * n_pad * fout_pad * cd_bytes   # conservative (2 buffers)
    resident_x = (adj_vmem + out_vmem + x_res_vmem) <= 40 * _MIB
    x_vmem = x_res_vmem if resident_x else 2 * 2 * tk * fout_pad * cd_bytes
    vmem_limit = int(min(48 * _MIB,
                         max(32 * _MIB, (adj_vmem + out_vmem + x_vmem) * 5 // 4)))

    if resident_x:
        x_spec = pl.BlockSpec((n_pad, fout_pad), lambda i, k: (0, 0))
    else:
        x_spec = pl.BlockSpec((tk, fout_pad), lambda i, k: (k, 0))

    x_read_passes = 1 if resident_x else n_pad // tm
    cost = pl.CostEstimate(
        flops=4 * n_pad * n_pad * fout_pad,
        transcendentals=0,
        bytes_accessed=(2 * n_pad * n_pad * adj_bytes
                        + x_read_passes * 2 * n_pad * fout_pad * cd_bytes
                        + 2 * n_pad * fout_pad * 4),
    )

    m_pad, s_pad = pl.pallas_call(
        _make_adj_agg_kernel(tk, resident_x),
        grid=(n_pad // tm, n_pad // tk),
        out_shape=(jax.ShapeDtypeStruct((n_pad, fout_pad), jnp.float32),
                   jax.ShapeDtypeStruct((n_pad, fout_pad), jnp.float32)),
        in_specs=[
            pl.BlockSpec((tm, tk), lambda i, k: (i, k)),   # adj_norm1 (f32)
            pl.BlockSpec((tm, tk), lambda i, k: (i, k)),   # adj_norm2 (f32)
            x_spec,                                        # X_mu
            x_spec,                                        # X_sg
        ],
        out_specs=(pl.BlockSpec((tm, fout_pad), lambda i, k: (i, 0)),
                   pl.BlockSpec((tm, fout_pad), lambda i, k: (i, 0))),
        compiler_params=pltpu.CompilerParams(
            dimension_semantics=("parallel", "arbitrary"),
            vmem_limit_bytes=vmem_limit),
        cost_estimate=cost,
    )(adj1_p, adj2_p, x_mu, x_sg)

    m_out = m_pad[:n, :fout].astype(out_dtype)
    s_out = s_pad[:n, :fout].astype(out_dtype)
    return m_out, s_out


def xavier_uniform(key, shape, dtype=jnp.float32):
    fan_in, fan_out = shape
    bound = math.sqrt(6.0 / (fan_in + fan_out))
    return jax.random.uniform(key, shape, dtype, minval=-bound, maxval=bound)


# ----------------------------------------------------------------------------
# Demo / test
# ----------------------------------------------------------------------------
if __name__ == "__main__":
    key = jax.random.PRNGKey(0)
    k_miu, k_sigma, k_adj1, k_adj2, k_wm, k_ws = jax.random.split(key, 6)

    N, IN_F, OUT_F = 64, 32, 16
    GAMMA = 1.0

    previous_miu = jax.random.normal(k_miu, (N, IN_F), jnp.float32)
    previous_sigma = jax.nn.softplus(
        jax.random.normal(k_sigma, (N, IN_F), jnp.float32))   # sigma >= 0
    adj_norm1 = jax.random.uniform(k_adj1, (N, N), jnp.float32) / N
    adj_norm2 = jax.random.uniform(k_adj2, (N, N), jnp.float32) / N

    weight_miu = xavier_uniform(k_wm, (IN_F, OUT_F))
    weight_sigma = xavier_uniform(k_ws, (IN_F, OUT_F))

    # pure-JAX reference
    att = jnp.exp(-GAMMA * previous_sigma)
    M_ref = adj_norm1 @ (previous_miu * att) @ weight_miu
    S_ref = adj_norm2 @ (previous_sigma * att * att) @ weight_sigma
    MM_ref = previous_miu @ weight_miu

    # --- main (adj) branch, f32 compute: tight check -------------------------
    M32, S32 = gaussian_convolution(previous_miu, previous_sigma,
                                    weight_miu, weight_sigma,
                                    adj_norm1, adj_norm2, gamma=GAMMA,
                                    compute_dtype=jnp.float32)
    jax.block_until_ready((M32, S32))
    assert jnp.allclose(M32, M_ref, atol=1e-4, rtol=1e-4)
    assert jnp.allclose(S32, S_ref, atol=1e-4, rtol=1e-4)

    # --- main (adj) branch, default bf16 MXU inputs (f32 accum): loose check -
    Mbf, Sbf = gaussian_convolution(previous_miu, previous_sigma,
                                    weight_miu, weight_sigma,
                                    adj_norm1, adj_norm2, gamma=GAMMA)
    jax.block_until_ready((Mbf, Sbf))
    assert jnp.allclose(Mbf, M_ref, atol=2e-2, rtol=2e-2)
    assert jnp.allclose(Sbf, S_ref, atol=2e-2, rtol=2e-2)

    # --- adj-free branch ------------------------------------------------------
    M0, S0 = gaussian_convolution(previous_miu, previous_sigma,
                                  weight_miu, weight_sigma,
                                  compute_dtype=jnp.float32)
    jax.block_until_ready((M0, S0))
    assert jnp.allclose(M0, MM_ref, atol=1e-4, rtol=1e-4)
    assert jnp.allclose(S0, MM_ref, atol=1e-4, rtol=1e-4)

    print("KERNEL_OK")
</pallas_src>

<mosaic_0001>
module attributes {stable_mosaic.version = 11 : i64} {
  func.func @_gate_transform_kernel(%arg0: i32, %arg1: memref<1xf32, #tpu.memory_space<smem>>, %arg2: memref<128x32xf32, #tpu.memory_space<vmem>>, %arg3: memref<128x32xf32, #tpu.memory_space<vmem>>, %arg4: memref<32x128xf32, #tpu.memory_space<vmem>>, %arg5: memref<32x128xf32, #tpu.memory_space<vmem>>, %arg6: memref<128x128xf32, #tpu.memory_space<vmem>>, %arg7: memref<128x128xf32, #tpu.memory_space<vmem>>) attributes {dimension_semantics = [#tpu.dimension_semantics<parallel>], iteration_bounds = array<i64: 1>, scalar_prefetch = 0 : i64, scratch_operands = 0 : i64, tpu.core_type = #tpu.core_type<tc>, window_params = [{transform_indices = @transform_0, window_bounds = array<i64: 1>}, {transform_indices = @transform_1, window_bounds = array<i64: 128, 32>}, {transform_indices = @transform_2, window_bounds = array<i64: 128, 32>}, {pipeline_mode = #tpu.pipeline_mode<synchronous>, transform_indices = @transform_3, window_bounds = array<i64: 32, 128>}, {pipeline_mode = #tpu.pipeline_mode<synchronous>, transform_indices = @transform_4, window_bounds = array<i64: 32, 128>}, {transform_indices = @transform_5, window_bounds = array<i64: 128, 128>}, {transform_indices = @transform_6, window_bounds = array<i64: 128, 128>}]} {
    %c0 = arith.constant 0 : index
    %0 = memref.load %arg1[%c0] : memref<1xf32, #tpu.memory_space<smem>>
    %c0_0 = arith.constant 0 : index
    %c0_1 = arith.constant 0 : index
    %1 = vector.load %arg2[%c0_0, %c0_1] : memref<128x32xf32, #tpu.memory_space<vmem>>, vector<128x32xf32>
    %c0_2 = arith.constant 0 : index
    %c0_3 = arith.constant 0 : index
    %2 = vector.load %arg3[%c0_2, %c0_3] : memref<128x32xf32, #tpu.memory_space<vmem>>, vector<128x32xf32>
    %cst = arith.constant 0.000000e+00 : f32
    %3 = arith.subf %cst, %0 : f32
    %4 = vector.broadcast %3 : f32 to vector<128x32xf32>
    %5 = arith.mulf %4, %2 : vector<128x32xf32>
    %6 = math.exp %5 : vector<128x32xf32>
    %7 = arith.mulf %1, %6 : vector<128x32xf32>
    %8 = arith.mulf %2, %6 : vector<128x32xf32>
    %9 = arith.mulf %8, %6 : vector<128x32xf32>
    %c0_4 = arith.constant 0 : index
    %c0_5 = arith.constant 0 : index
    %10 = vector.load %arg4[%c0_4, %c0_5] : memref<32x128xf32, #tpu.memory_space<vmem>>, vector<32x128xf32>
    %cst_6 = arith.constant dense<0.000000e+00> : vector<128x128xf32>
    %11 = tpu.matmul %7, %10, %cst_6 {dimension_numbers = #tpu.dot_dimension_numbers<[1], [0], [0], [1], [0, 0, 1, 1], [], []>} : vector<128x32xf32>, vector<32x128xf32>, vector<128x128xf32> -> vector<128x128xf32>
    %c0_7 = arith.constant 0 : index
    %c0_8 = arith.constant 0 : index
    %12 = vector.load %arg6[%c0_7, %c0_8] : memref<128x128xf32, #tpu.memory_space<vmem>>, vector<128x128xf32>
    tpu.vector_store %arg6[%c0_7, %c0_8], %11 {strides = array<i32>} : memref<128x128xf32, #tpu.memory_space<vmem>>, vector<128x128xf32>,
    %c0_9 = arith.constant 0 : index
    %c0_10 = arith.constant 0 : index
    %13 = vector.load %arg5[%c0_9, %c0_10] : memref<32x128xf32, #tpu.memory_space<vmem>>, vector<32x128xf32>
    %cst_11 = arith.constant dense<0.000000e+00> : vector<128x128xf32>
    %14 = tpu.matmul %9, %13, %cst_11 {dimension_numbers = #tpu.dot_dimension_numbers<[1], [0], [0], [1], [0, 0, 1, 1], [], []>} : vector<128x32xf32>, vector<32x128xf32>, vector<128x128xf32> -> vector<128x128xf32>
    %c0_12 = arith.constant 0 : index
    %c0_13 = arith.constant 0 : index
    %15 = vector.load %arg7[%c0_12, %c0_13] : memref<128x128xf32, #tpu.memory_space<vmem>>, vector<128x128xf32>
    tpu.vector_store %arg7[%c0_12, %c0_13], %14 {strides = array<i32>} : memref<128x128xf32, #tpu.memory_space<vmem>>, vector<128x128xf32>,
    return
  }
  func.func @transform_0(%arg0: i32) -> i32 {
    %c0_i32 = arith.constant 0 : i32
    %c0_i32_0 = arith.constant 0 : i32
    return %c0_i32 : i32
  }
  func.func @transform_1(%arg0: i32) -> (i32, i32) {
    %c0_i32 = arith.constant 0 : i32
    %c0_i32_0 = arith.constant 0 : i32
    return %arg0, %c0_i32 : i32, i32
  }
  func.func @transform_2(%arg0: i32) -> (i32, i32) {
    %c0_i32 = arith.constant 0 : i32
    %c0_i32_0 = arith.constant 0 : i32
    return %arg0, %c0_i32 : i32, i32
  }
  func.func @transform_3(%arg0: i32) -> (i32, i32) {
    %c0_i32 = arith.constant 0 : i32
    %c0_i32_0 = arith.constant 0 : i32
    %c0_i32_1 = arith.constant 0 : i32
    return %c0_i32, %c0_i32_0 : i32, i32
  }
  func.func @transform_4(%arg0: i32) -> (i32, i32) {
    %c0_i32 = arith.constant 0 : i32
    %c0_i32_0 = arith.constant 0 : i32
    %c0_i32_1 = arith.constant 0 : i32
    return %c0_i32, %c0_i32_0 : i32, i32
  }
  func.func @transform_5(%arg0: i32) -> (i32, i32) {
    %c0_i32 = arith.constant 0 : i32
    %c0_i32_0 = arith.constant 0 : i32
    return %arg0, %c0_i32 : i32, i32
  }
  func.func @transform_6(%arg0: i32) -> (i32, i32) {
    %c0_i32 = arith.constant 0 : i32
    %c0_i32_0 = arith.constant 0 : i32
    return %arg0, %c0_i32 : i32, i32
  }
}

</mosaic_0001>

<bundles_post_ra>
// kernel: tpu_custom_call.1
= control target key start
LH: loop header
LB: loop body
LE: loop exit
PB: predicated region body
PF: predicated region fallthrough
CT: control target
= control target key end

     0   :  { %13 = vsyncpa [#allocation4], 0  ;;  %s1165_s0 = inlined_call_operand.<no memory space> [shape: f32[1], index: 0, kind: input, shape index: {}]   ;;  %s1166_s1 = inlined_call_operand.vmem [shape: f32[128,32], index: 1, kind: input, shape index: {}]   ;;  %s1167_s2 = inlined_call_operand.vmem [shape: f32[128,32], index: 2, kind: input, shape index: {}]   ;;  %s1168_s3 = inlined_call_operand.vmem [shape: f32[32,128], index: 3, kind: input, shape index: {}]   ;;  %s1169_s4 = inlined_call_operand.vmem [shape: f32[32,128], index: 4, kind: input, shape index: {}]   ;;  %s1170_s5 = inlined_call_operand.hbm [shape: f32[128,128], index: 5, kind: output, shape index: {0}]   ;;  %s1171_s6 = inlined_call_operand.hbm [shape: f32[128,128], index: 6, kind: output, shape index: {1}]  }
   0x1   :  { %v156_v0 = vld [vmem:[%s1168_s3] sm:$0xff]  ;;  %v157_v1 = vld [vmem:[%s1168_s3 + $0x8] sm:$0xff]  ;;  %s58_s29 = ssub.f32 0.0, %s1165_s0  ;;  %v158_v5 = vld [vmem:[%s1168_s3 + $0x10] sm:$0xff] }
   0x2   :  { %v370_v2 = vld [vmem:[%s1169_s4] sm:$0xff]  ;;  %v751_v3 = vpack.c.bf16 %v157_v1, %v156_v0  ;;  %v371_v4 = vld [vmem:[%s1169_s4 + $0x8] sm:$0xff]  ;;  %v159_v6 = vld [vmem:[%s1168_s3 + $0x18] sm:$0xff] }
   0x3   :  { %v759_v7 = vpack.c.bf16 %v371_v4, %v370_v2  ;;  %v755_v8 = vpack.c.bf16 %v159_v6, %v158_v5  ;;  %v372_v9 = vld [vmem:[%s1169_s4 + $0x10] sm:$0xff]  ;;  %v373_v10 = vld [vmem:[%s1169_s4 + $0x18] sm:$0xff]  ;;  %v917_v11 = vstv %s58_s29  ;;  %v922_v13 = vld [vmem:[%s1167_s2] sm:$0xff] }
   0x4   :  { %752 = vmatprep.subr.bf16.mxu0 %v751_v3  ;;  %v763_v12 = vpack.c.bf16 %v373_v10, %v372_v9  ;;  %v927_v14 = vld [vmem:[%s1167_s2 + $0x8] sm:$0xff]  ;;  %v60_v15 = vmul.f32 %v917_v11, %v922_v13  ;;  %v936_v17 = vld [vmem:[%s1167_s2 + $0x10] sm:$0xff]  ;;  %v943_v19 = vld [vmem:[%s1167_s2 + $0x18] sm:$0xff] }
   0x5   :  { %754 = vmatpush3.bf16.msra.mxu0 %v751_v3  ;;  %760 = vmatprep.subr.bf16.mxu1 %v759_v7  ;;  %v61_v16 = vmul.f32 %v917_v11, %v927_v14  ;;  %v62_v18 = vmul.f32 %v917_v11, %v936_v17  ;;  %v948_v20 = vld [vmem:[%s1167_s2 + $0x20] sm:$0xff]  ;;  %v63_v23 = vmul.f32 %v917_v11, %v943_v19  ;;  %v957_v25 = vld [vmem:[%s1167_s2 + $0x28] sm:$0xff]  ;;  %v964_v28 = vld [vmem:[%s1167_s2 + $0x30] sm:$0xff] }
   0x6   :  { %762 = vmatpush3.bf16.msra.mxu1 %v759_v7  ;;  %756 = vmatprep.subr.bf16.mxu0 %v755_v8  ;;  %v76_v21 = vmul.f32 1.442695, %v60_v15  ;;  %v64_v24 = vmul.f32 %v917_v11, %v948_v20  ;;  %v65_v27 = vmul.f32 %v917_v11, %v957_v25  ;;  %v66_v31 = vmul.f32 %v917_v11, %v964_v28  ;;  %v971_v32 = vld [vmem:[%s1167_s2 + $0x38] sm:$0xff]  ;;  %v978_v35 = vld [vmem:[%s1167_s2 + $0x40] sm:$0xff]  ;;  %v983_v36 = vld [vmem:[%s1167_s2 + $0x48] sm:$0xff] }
   0x7   :  { %764 = vmatprep.subr.bf16.mxu1 %v763_v12  ;;  %v78_v22 = vmul.f32 1.442695, %v61_v16  ;;  %v80_v26 = vmul.f32 1.442695, %v62_v18  ;;  %v82_v29 = vmul.f32 1.442695, %v63_v23  ;;  %v67_v34 = vmul.f32 %v917_v11, %v971_v32 }
   0x8   :  { %771 = vpow2.f32 %v76_v21  ;;  %v84_v30 = vmul.f32 1.442695, %v64_v24  ;;  %v86_v33 = vmul.f32 1.442695, %v65_v27  ;;  %v88_v37 = vmul.f32 1.442695, %v66_v31 }
   0x9   :  { %758 = vmatpush3.bf16.msra.mxu0 %v755_v8  ;;  %773 = vpow2.f32 %v78_v22  ;;  %v68_v38 = vmul.f32 %v917_v11, %v978_v35  ;;  %v990_v39 = vld [vmem:[%s1167_s2 + $0x50] sm:$0xff]  ;;  %v90_v40 = vmul.f32 1.442695, %v67_v34  ;;  %v69_v41 = vmul.f32 %v917_v11, %v983_v36  ;;  %v997_v42 = vld [vmem:[%s1167_s2 + $0x58] sm:$0xff]  ;;  %v1004_v45 = vld [vmem:[%s1167_s2 + $0x60] sm:$0xff] }
   0xa   :  { %766 = vmatpush3.bf16.msra.mxu1 %v763_v12  ;;  %775 = vpow2.f32 %v80_v26  ;;  %v70_v44 = vmul.f32 %v917_v11, %v990_v39  ;;  %v71_v46 = vmul.f32 %v917_v11, %v997_v42  ;;  %v1011_v47 = vld [vmem:[%s1167_s2 + $0x68] sm:$0xff] }
   0xb   :  { %777 = vpow2.f32 %v82_v29  ;;  %v92_v43 = vmul.f32 1.442695, %v68_v38 }
   0xc   :  { %779 = vpow2.f32 %v84_v30 }
   0xd   :  { %781 = vpow2.f32 %v86_v33 }
   0xe   :  { %783 = vpow2.f32 %v88_v37 }
   0xf   :  { %14 = vsyncpa [#allocation6], 0  ;;  %785 = vpow2.f32 %v90_v40  ;;  %v94_v48 = vmul.f32 1.442695, %v69_v41  ;;  %v26_v49 = vld [vmem:[%s1166_s1] sm:$0xff]  ;;  %v72_v51 = vmul.f32 %v917_v11, %v1004_v45  ;;  %v1021_v52 = vld [vmem:[%s1167_s2 + $0x70] sm:$0xff]  ;;  %v73_v54 = vmul.f32 %v917_v11, %v1011_v47 }
  0x10   :  { %787 = vpow2.f32 %v92_v43  ;;  %v96_v50 = vmul.f32 1.442695, %v70_v44  ;;  %v27_v53 = vld [vmem:[%s1166_s1 + $0x8] sm:$0xff]  ;;  %vm160_vm0 = vcmask 261120   ;;  %v28_v56 = vld [vmem:[%s1166_s1 + $0x10] sm:$0xff]  ;;  %v29_v61 = vld [vmem:[%s1166_s1 + $0x18] sm:$0xff]  ;;  %v74_v62 = vmul.f32 %v917_v11, %v1021_v52 }
  0x11   :  { %v98_v57 = vmul.f32 1.442695, %v71_v46  ;;  %789 = vpow2.f32 %v94_v48  ;;  %v1040_v63 = vld [vmem:[%s1167_s2 + $0x78] sm:$0xff]  ;;  %v30_v3 = vld [vmem:[%s1166_s1 + $0x20] sm:$0xff]  ;;  %v100_v4 = vmul.f32 1.442695, %v72_v51 }
  0x12   :  { %v772_v55 = vpop.eup %771  ;;  %791 = vpow2.f32 %v96_v50  ;;  %v102_v9 = vmul.f32 1.442695, %v73_v54  ;;  %v75_v15 = vmul.f32 %v917_v11, %v1040_v63  ;;  %v32_v24 = vld [vmem:[%s1166_s1 + $0x30] sm:$0xff]  ;;  %v104_v26 = vmul.f32 1.442695, %v74_v62  ;;  %s852_s23 = smov [#allocation5]  }
  0x13   :  { %v774_v58 = vpop.eup %773  ;;  %v108_v59 = vmul.f32 %v772_v55, %v26_v49  ;;  %v124_v60 = vmul.f32 %v772_v55, %v922_v13  ;;  %793 = vpow2.f32 %v98_v57  ;;  %s600_s24 = sshll.u32 %s852_s23, 4  ;;  %s1129_s24 = int_to_ptr.vmem [resolvable:$true] %s600_s24 }
  0x14   :  { %v776_v0 = vpop.eup %775  ;;  %v109_v1 = vmul.f32 %v774_v58, %v27_v53  ;;  %v125_v2 = vmul.f32 %v774_v58, %v927_v14  ;;  %795 = vpow2.f32 %v100_v4  ;;  %v106_v34 = vmul.f32 1.442695, %v75_v15 }
  0x15   :  { %v778_v5 = vpop.eup %777  ;;  %695 = vmatprep.mubr.msk.f32.mxu0 %vm160_vm0, %v108_v59  ;;  %v140_v6 = vmul.f32 %v772_v55, %v124_v60  ;;  %v110_v7 = vmul.f32 %v776_v0, %v28_v56  ;;  %v126_v8 = vmul.f32 %v776_v0, %v936_v17  ;;  %v31_v17 = vld [vmem:[%s1166_s1 + $0x28] sm:$0xff]  ;;  %797 = vpow2.f32 %v102_v9 }
  0x16   :  { %v780_v10 = vpop.eup %779  ;;  %696 = vmatmul.mubr.msk.f32.vlgmr.msra.gmra.mrb[0].mxu0 %vm160_vm0, %v109_v1  ;;  %v141_v12 = vmul.f32 %v774_v58, %v125_v2  ;;  %v111_v13 = vmul.f32 %v778_v5, %v29_v61  ;;  %v127_v14 = vmul.f32 %v778_v5, %v943_v19  ;;  %799 = vpow2.f32 %v104_v26 }
  0x17   :  { %v782_v16 = vpop.eup %781  ;;  %727 = vmatprep.mubr.msk.f32.mxu1 %vm160_vm0, %v140_v6  ;;  %698 = vmatprep.mubr.msk.f32.mxu0 %vm160_vm0, %v110_v7  ;;  %v142_v18 = vmul.f32 %v776_v0, %v126_v8  ;;  %v112_v21 = vmul.f32 %v780_v10, %v30_v3  ;;  %v128_v22 = vmul.f32 %v780_v10, %v948_v20  ;;  %801 = vpow2.f32 %v106_v34 }
  0x18   :  { %v784_v23 = vpop.eup %783  ;;  %728 = vmatmul.mubr.msk.f32.vlgmr.msra.gmra.mrb[0].mxu1 %vm160_vm0, %v141_v12  ;;  %v143_v19 = vmul.f32 %v778_v5, %v127_v14  ;;  %v129_v11 = vmul.f32 %v782_v16, %v957_v25  ;;  %v113_v31 = vmul.f32 %v782_v16, %v31_v17  ;;  %v33_v25 = vld [vmem:[%s1166_s1 + $0x38] sm:$0xff] }
  0x19   :  { %v786_v27 = vpop.eup %785  ;;  %730 = vmatprep.mubr.msk.f32.mxu1 %vm160_vm0, %v142_v18  ;;  %v144_v29 = vmul.f32 %v780_v10, %v128_v22  ;;  %v130_v30 = vmul.f32 %v784_v23, %v964_v28  ;;  %v114_v33 = vmul.f32 %v784_v23, %v32_v24  ;;  %v34_v28 = vld [vmem:[%s1166_s1 + $0x40] sm:$0xff] }
  0x1a   :  { %v788_v20 = vpop.eup %787  ;;  %699 = vmatmul.mubr.msk.f32.gmra.mrb[2].mxu0 %vm160_vm0, %v111_v13  ;;  %v145_v37 = vmul.f32 %v782_v16, %v129_v11  ;;  %v131_v38 = vmul.f32 %v786_v27, %v971_v32  ;;  %v115_v46 = vmul.f32 %v786_v27, %v33_v25  ;;  %v35_v32 = vld [vmem:[%s1166_s1 + $0x48] sm:$0xff] }
  0x1b   :  { %701 = vmatprep.mubr.msk.f32.mxu0 %vm160_vm0, %v112_v21  ;;  %v790_v40 = vpop.eup %789  ;;  %v146_v41 = vmul.f32 %v784_v23, %v130_v30  ;;  %v132_v43 = vmul.f32 %v788_v20, %v978_v35  ;;  %v116_v48 = vmul.f32 %v788_v20, %v34_v28  ;;  %v36_v35 = vld [vmem:[%s1166_s1 + $0x50] sm:$0xff] }
  0x1c   :  { %731 = vmatmul.mubr.msk.f32.gmra.mrb[2].mxu1 %vm160_vm0, %v143_v19  ;;  %v792_v44 = vpop.eup %791  ;;  %v147_v49 = vmul.f32 %v786_v27, %v131_v38  ;;  %v133_v50 = vmul.f32 %v790_v40, %v983_v36  ;;  %v117_v56 = vmul.f32 %v790_v40, %v35_v32  ;;  %v37_v36 = vld [vmem:[%s1166_s1 + $0x58] sm:$0xff] }
  0x1d   :  { %733 = vmatprep.mubr.msk.f32.mxu1 %vm160_vm0, %v144_v29  ;;  %v794_v51 = vpop.eup %793  ;;  %v148_v53 = vmul.f32 %v788_v20, %v132_v43  ;;  %v134_v54 = vmul.f32 %v792_v44, %v990_v39  ;;  %v118_v57 = vmul.f32 %v792_v44, %v36_v35  ;;  %v38_v39 = vld [vmem:[%s1166_s1 + $0x60] sm:$0xff] }
  0x1e   :  { %702 = vmatmul.mubr.msk.f32.gmra.mrb[4].mxu0 %vm160_vm0, %v113_v31  ;;  %v796_v55 = vpop.eup %795  ;;  %v149_v58 = vmul.f32 %v790_v40, %v133_v50  ;;  %v135_v59 = vmul.f32 %v794_v51, %v997_v42  ;;  %v119_v1 = vmul.f32 %v794_v51, %v37_v36  ;;  %v39_v42 = vld [vmem:[%s1166_s1 + $0x68] sm:$0xff] }
  0x1f   :  { %704 = vmatprep.mubr.msk.f32.mxu0 %vm160_vm0, %v114_v33  ;;  %v798_v60 = vpop.eup %797  ;;  %v150_v61 = vmul.f32 %v792_v44, %v134_v54  ;;  %v136_v62 = vmul.f32 %v796_v55, %v1004_v45  ;;  %v120_v2 = vmul.f32 %v796_v55, %v38_v39  ;;  %v40_v45 = vld [vmem:[%s1166_s1 + $0x70] sm:$0xff] }
  0x20   :  { %734 = vmatmul.mubr.msk.f32.gmra.mrb[4].mxu1 %vm160_vm0, %v145_v37  ;;  %v800_v0 = vpop.eup %799  ;;  %v151_v3 = vmul.f32 %v794_v51, %v135_v59  ;;  %v137_v4 = vmul.f32 %v798_v60, %v1011_v47  ;;  %v121_v8 = vmul.f32 %v798_v60, %v39_v42  ;;  %v41_v47 = vld [vmem:[%s1166_s1 + $0x78] sm:$0xff]  ;;  %s851_s1 = smov [#allocation3]  }
  0x21   :  { %736 = vmatprep.mubr.msk.f32.mxu1 %vm160_vm0, %v146_v41  ;;  %v802_v5 = vpop.eup %801  ;;  %v152_v6 = vmul.f32 %v796_v55, %v136_v62  ;;  %v138_v7 = vmul.f32 %v800_v0, %v1021_v52  ;;  %v122_v9 = vmul.f32 %v800_v0, %v40_v45  ;;  %s588_s22 = sshll.u32 %s851_s1, 4  ;;  %s1127_s22 = int_to_ptr.vmem [resolvable:$true] %s588_s22 }
  0x22   :  { %705 = vmatmul.mubr.msk.f32.gmra.mrb[6].mxu0 %vm160_vm0, %v115_v46  ;;  %v153_v10 = vmul.f32 %v798_v60, %v137_v4  ;;  %v139_v12 = vmul.f32 %v802_v5, %v1040_v63  ;;  %v123_v52 = vmul.f32 %v802_v5, %v41_v47  ;;  %s803_s25 = scalar_lea.vmem %s1127_s22, 2048  ;;  %p808_p1 = scmp.lt.s32.totalorder %s1127_s22, %s1127_s22 }
  0x23   :  { %707 = vmatprep.mubr.msk.f32.mxu0 %vm160_vm0, %v116_v48  ;;  %v154_v13 = vmul.f32 %v800_v0, %v138_v7  ;;  %p804_p0 = scmp.ne.s32.totalorder %s1127_s22, %s803_s25  ;;  %p809_p2 = scmp.lt.s32.totalorder %s803_s25, %s803_s25 }
  0x24   :  { %737 = vmatmul.mubr.msk.f32.gmra.mrb[6].mxu1 %vm160_vm0, %v147_v49  ;;  %v155_v14 = vmul.f32 %v802_v5, %v139_v12 }
  0x25   :  { %739 = vmatprep.mubr.msk.f32.mxu1 %vm160_vm0, %v148_v53  ;;  %p810_p3 = por %p809_p2, %p808_p1 }
  0x26   :  { %708 = vmatmul.mubr.msk.f32.gmra.mrb[8].mxu0 %vm160_vm0, %v117_v56 }
  0x27   :  { %710 = vmatprep.mubr.msk.f32.mxu0 %vm160_vm0, %v118_v57  ;;  %p811_p4 = pnand %p810_p3, %p804_p0 }
  0x28   :  { %740 = vmatmul.mubr.msk.f32.gmra.mrb[8].mxu1 %vm160_vm0, %v149_v58 }
  0x29   :  { %742 = vmatprep.mubr.msk.f32.mxu1 %vm160_vm0, %v150_v61 }
  0x2a   :  { %711 = vmatmul.mubr.msk.f32.gmra.mrb[10].mxu0 %vm160_vm0, %v119_v1 }
  0x2b   :  { %713 = vmatprep.mubr.msk.f32.mxu0 %vm160_vm0, %v120_v2 }
  0x2c   :  { %743 = vmatmul.mubr.msk.f32.gmra.mrb[10].mxu1 %vm160_vm0, %v151_v3 }
  0x2d   :  { %745 = vmatprep.mubr.msk.f32.mxu1 %vm160_vm0, %v152_v6 }
  0x2e   :  { %714 = vmatmul.mubr.msk.f32.gmra.mrb[12].mxu0 %vm160_vm0, %v121_v8 }
  0x2f   :  { %716 = vmatprep.mubr.msk.f32.mxu0 %vm160_vm0, %v122_v9 }
  0x30   :  { %746 = vmatmul.mubr.msk.f32.gmra.mrb[12].mxu1 %vm160_vm0, %v153_v10 }
  0x31   :  { %748 = vmatprep.mubr.msk.f32.mxu1 %vm160_vm0, %v154_v13 }
  0x32   :  { %717 = vmatmul.mubr.msk.f32.gmra.mrb[14].mxu0 %vm160_vm0, %v123_v52 }
  0x34   :  { %749 = vmatmul.mubr.msk.f32.gmra.mrb[14].mxu1 %vm160_vm0, %v155_v14 }
  0xe9   :  { %v697_v15 = vpop.f32.mrb[0].mxu0 }
  0xea   :  { %355 = vst [vmem:[#allocation3 + $0x8] sm:$0xff] %v697_v15  ;;  %v275_v63 = vpop.f32.mrb[1].mxu0 }
  0xeb   :  { %354 = vst [vmem:[#allocation3] sm:$0xff] %v275_v63  ;;  %v729_v16 = vpop.f32.mrb[0].mxu1 }
  0xec   :  { %568 = vst [vmem:[#allocation5 + $0x8] sm:$0xff] %v729_v16  ;;  %v488_v18 = vpop.f32.mrb[1].mxu1 }
  0xed   :  { %567 = vst [vmem:[#allocation5] sm:$0xff] %v488_v18  ;;  %v700_v21 = vpop.f32.mrb[2].mxu0 }
  0xee   :  { %357 = vst [vmem:[#allocation3 + $0x18] sm:$0xff] %v700_v21  ;;  %v285_v17 = vpop.f32.mrb[3].mxu0 }
  0xef   :  { %356 = vst [vmem:[#allocation3 + $0x10] sm:$0xff] %v285_v17  ;;  %v732_v22 = vpop.f32.mrb[2].mxu1 }
  0xf0   :  { %570 = vst [vmem:[#allocation5 + $0x18] sm:$0xff] %v732_v22  ;;  %v498_v23 = vpop.f32.mrb[3].mxu1 }
  0xf1   :  { %569 = vst [vmem:[#allocation5 + $0x10] sm:$0xff] %v498_v23  ;;  %v703_v19 = vpop.f32.mrb[4].mxu0 }
  0xf2   :  { %359 = vst [vmem:[#allocation3 + $0x28] sm:$0xff] %v703_v19  ;;  %v295_v11 = vpop.f32.mrb[5].mxu0 }
  0xf3   :  { %358 = vst [vmem:[#allocation3 + $0x20] sm:$0xff] %v295_v11  ;;  %v735_v24 = vpop.f32.mrb[4].mxu1 }
  0xf4   :  { %572 = vst [vmem:[#allocation5 + $0x28] sm:$0xff] %v735_v24  ;;  %v508_v26 = vpop.f32.mrb[5].mxu1 }
  0xf5   :  { %571 = vst [vmem:[#allocation5 + $0x20] sm:$0xff] %v508_v26  ;;  %v706_v27 = vpop.f32.mrb[6].mxu0 }
  0xf6   :  { %361 = vst [vmem:[#allocation3 + $0x38] sm:$0xff] %v706_v27  ;;  %v305_v29 = vpop.f32.mrb[7].mxu0 }
  0xf7   :  { %360 = vst [vmem:[#allocation3 + $0x30] sm:$0xff] %v305_v29  ;;  %v738_v30 = vpop.f32.mrb[6].mxu1 }
  0xf8   :  { %574 = vst [vmem:[#allocation5 + $0x38] sm:$0xff] %v738_v30  ;;  %v518_v20 = vpop.f32.mrb[7].mxu1 }
  0xf9   :  { %573 = vst [vmem:[#allocation5 + $0x30] sm:$0xff] %v518_v20  ;;  %v709_v31 = vpop.f32.mrb[8].mxu0 }
  0xfa   :  { %363 = vst [vmem:[#allocation3 + $0x48] sm:$0xff] %v709_v31  ;;  %v315_v33 = vpop.f32.mrb[9].mxu0 }
  0xfb   :  { %362 = vst [vmem:[#allocation3 + $0x40] sm:$0xff] %v315_v33  ;;  %v741_v25 = vpop.f32.mrb[8].mxu1 }
  0xfc   :  { %576 = vst [vmem:[#allocation5 + $0x48] sm:$0xff] %v741_v25  ;;  %v528_v34 = vpop.f32.mrb[9].mxu1 }
  0xfd   :  { %575 = vst [vmem:[#allocation5 + $0x40] sm:$0xff] %v528_v34  ;;  %v712_v37 = vpop.f32.mrb[10].mxu0 }
  0xfe   :  { %365 = vst [vmem:[#allocation3 + $0x58] sm:$0xff] %v712_v37  ;;  %v325_v38 = vpop.f32.mrb[11].mxu0 }
  0xff   :  { %364 = vst [vmem:[#allocation3 + $0x50] sm:$0xff] %v325_v38  ;;  %v744_v28 = vpop.f32.mrb[10].mxu1 }
 0x100   :  { %578 = vst [vmem:[#allocation5 + $0x58] sm:$0xff] %v744_v28  ;;  %v538_v40 = vpop.f32.mrb[11].mxu1 }
 0x101   :  { %577 = vst [vmem:[#allocation5 + $0x50] sm:$0xff] %v538_v40  ;;  %v715_v41 = vpop.f32.mrb[12].mxu0 }
 0x102   :  { %367 = vst [vmem:[#allocation3 + $0x68] sm:$0xff] %v715_v41  ;;  %v335_v43 = vpop.f32.mrb[13].mxu0 }
 0x103   :  { %366 = vst [vmem:[#allocation3 + $0x60] sm:$0xff] %v335_v43  ;;  %v747_v44 = vpop.f32.mrb[12].mxu1 }
 0x104   :  { %580 = vst [vmem:[#allocation5 + $0x68] sm:$0xff] %v747_v44  ;;  %v548_v46 = vpop.f32.mrb[13].mxu1 }
 0x105   :  { %579 = vst [vmem:[#allocation5 + $0x60] sm:$0xff] %v548_v46  ;;  %v718_v48 = vpop.f32.mrb[14].mxu0 }
 0x106   :  { %369 = vst [vmem:[#allocation3 + $0x78] sm:$0xff] %v718_v48  ;;  %v345_v32 = vpop.f32.mrb[15].mxu0 }
 0x107   :  { %368 = vst [vmem:[#allocation3 + $0x70] sm:$0xff] %v345_v32  ;;  %v750_v49 = vpop.f32.mrb[14].mxu1 }
 0x108   :  { %582 = vst [vmem:[#allocation5 + $0x78] sm:$0xff] %v750_v49  ;;  %v558_v50 = vpop.f32.mrb[15].mxu1 }
 0x109   :  { %814 = shalt.err (!%p811_p4)
}
 0x10a   :  { %s815_s2 = scalar_lea.hbm %s1170_s5, 2048 }
 0x10b   :  { %p816_p5 = scmp.ne.s32.totalorder %s1170_s5, %s815_s2  ;;  %p819_p6 = scmp.lt.u32.totalorder %s815_s2, %s1170_s5 }
 0x10d   :  { %p821_p7 = pnand %p819_p6, %p816_p5 }
 0x10f   :  { %824 = shalt.err (!%p821_p7)
}
 0x110   :  { %s853_s8 = smov 128   ;;  %s854_s9 = smov 8   ;;  %581 = vst [vmem:[#allocation5 + $0x70] sm:$0xff] %v558_v50 }
 0x111   :  { %594 = dma.vmem_to_hbm [thread:$0]  %s1127_s22, 2048, %s1170_s5, [#allocation4], %s853_s8, %s853_s8, %s854_s9  }
 0x112   :  { %s825_s12 = scalar_lea.vmem %s1129_s24, 2048  ;;  %p830_p9 = scmp.lt.s32.totalorder %s1129_s24, %s1129_s24 }
 0x113   :  { %p826_p8 = scmp.ne.s32.totalorder %s1129_s24, %s825_s12  ;;  %p831_p10 = scmp.lt.s32.totalorder %s825_s12, %s825_s12 }
 0x115   :  { %p832_p11 = por %p831_p10, %p830_p9 }
 0x117   :  { %p833_p12 = pnand %p832_p11, %p826_p8 }
 0x119   :  { %836 = shalt.err (!%p833_p12)
}
 0x11a   :  { %s837_s14 = scalar_lea.hbm %s1171_s6, 2048 }
 0x11b   :  { %p838_p13 = scmp.ne.s32.totalorder %s1171_s6, %s837_s14  ;;  %p841_p0 = scmp.lt.u32.totalorder %s837_s14, %s1171_s6 }
 0x11d   :  { %p843_p1 = pnand %p841_p0, %p838_p13 }
 0x11f   :  { %846 = shalt.err (!%p843_p1)
}
 0x120   :  { %606 = dma.vmem_to_hbm [thread:$0]  %s1129_s24, 2048, %s1171_s6, [#allocation6], %s853_s8, %s853_s8, %s854_s9  }
 0x121   :  { %847 = dma.done.wait [#allocation4], 2048  }
 0x122   :  { %848 = vsyncadd [#allocation4], 4294965248 }
 0x123   :  { %849 = dma.done.wait [#allocation6], 2048  }
 0x124   :  { %850 = vsyncadd [#allocation6], 4294965248 }
 0x125   :  { %613 = vsyncpa [#allocation4], 1 }
 0x126   :  { %614 = vsyncpa [#allocation6], 1 }

</bundles_post_ra>
